<compile_context>
chip_gen: v6e
topology: v6e:2x2x1
jax: 0.10.0
libtpu: 0.0.40
codegen_flags: <defaults>
</compile_context>

<pallas_src>
import functools

import jax
import jax.numpy as jnp
from jax.experimental import pallas as pl
from jax.experimental.pallas import tpu as pltpu


def _down_wt_kernel(q_ref, w_ref, shift_ref, o_ref):
    """(tile_m, 4C) quadrant rows @ (4C, out_ch) folded weights + shift + ReLU."""
    y = jnp.dot(q_ref[...], w_ref[...], preferred_element_type=jnp.float32)
    y = y + shift_ref[...]           # folded (conv bias * bn_scale + bn_shift)
    o_ref[...] = jnp.maximum(y, 0.0).astype(o_ref.dtype)


def _choose_tile_m(M, K, out_ch):
    """Largest sublane-aligned row tile that fits a modest VMEM budget and
    keeps >= 2 grid steps (so both v7x TensorCores get work)."""
    if M <= 8:
        return M
    vmem_budget = 8 * 1024 * 1024          # conservative: fine on v5e/v6e/v7x
    per_row = 2 * (K + out_ch) * 4         # double-buffered f32 in + out rows
    t = max(8, vmem_budget // per_row)
    t = min(t, 2048)                       # per-step overhead already amortized
    t = min(t, -(-M // 2))                 # keep at least 2 grid steps
    t = max(8, (t // 8) * 8)               # sublane alignment
    return min(t, M)


@functools.partial(jax.jit, static_argnames=("eps",))
def down_wt_forward(x, conv_w, conv_b, gamma, beta, run_mean, run_var,
                    eps=1e-5):
    """x: (N, C, H, W) float32 (NCHW). Returns (N, out_ch, H//2, W//2)."""
    N, C, H, W = x.shape
    assert H % 2 == 0 and W % 2 == 0
    Ho, Wo = H // 2, W // 2
    M = N * Ho * Wo
    out_ch = conv_w.shape[0]
    K = 4 * C

    # ---- single space-to-depth (pure reshape/transpose glue) ----
    # Quadrants a=x[2r,2c], b=x[2r,2c+1], c=x[2r+1,2c], d=x[2r+1,2c+1];
    # rows indexed by (n, ho, wo), columns ordered [a | b | c | d] x channels.
    q = x.reshape(N, C, Ho, 2, Wo, 2)
    q = q.transpose(0, 2, 4, 3, 5, 1).reshape(M, K)

    # ---- fold Haar + BatchNorm + conv bias into (4C, out_ch) weights ----
    # conv_w: (out_ch, 4C, 1, 1); input-channel blocks are the concat order
    # [LL, band0 (loW,hiH), band1 (hiW,loH), band2 (HH)], each of size C.
    w4 = conv_w.reshape(out_ch, 4, C).transpose(1, 2, 0)   # (4 subbands, C, out_ch)
    # Haar (pywt 'haar', zero mode, even H/W) expressed on quadrants:
    #   LL    = (a + b + c + d)/2
    #   band0 = (a + b - c - d)/2     (low along W, high along H)
    #   band1 = (a - b + c - d)/2     (high along W, low along H)
    #   band2 = (a - b - c + d)/2     (HH)
    # => W_quadrant[q] = 0.5 * sum_s T[q, s] * W_subband[s]
    haar_t = 0.5 * jnp.array([[1.0, 1.0, 1.0, 1.0],
                              [1.0, 1.0, -1.0, -1.0],
                              [1.0, -1.0, 1.0, -1.0],
                              [1.0, -1.0, -1.0, 1.0]], dtype=jnp.float32)
    w_eff = jnp.einsum('qs,sco->qco', haar_t, w4).reshape(K, out_ch)

    # Inference BatchNorm folded per output channel.
    scale = gamma / jnp.sqrt(run_var + eps)
    shift = beta - run_mean * scale
    w_eff = w_eff * scale[None, :]
    shift_eff = (conv_b * scale + shift)[None, :]           # (1, out_ch)

    tile_m = _choose_tile_m(M, K, out_ch)
    grid = (pl.cdiv(M, tile_m),)

    # NOTE: with very small channel counts (demo sizes) the last dims are
    # lane-sparse; for production shapes with C/out_ch >= 128 the blocks are
    # lane-dense and this layout is near the HBM roofline.
    y = pl.pallas_call(
        _down_wt_kernel,
        out_shape=jax.ShapeDtypeStruct((M, out_ch), jnp.float32),
        grid=grid,
        in_specs=[
            pl.BlockSpec((tile_m, K), lambda i: (i, 0)),      # quadrant rows
            pl.BlockSpec((K, out_ch), lambda i: (0, 0)),      # folded weights
            pl.BlockSpec((1, out_ch), lambda i: (0, 0)),      # folded shift
        ],
        out_specs=pl.BlockSpec((tile_m, out_ch), lambda i: (i, 0)),
        compiler_params=pltpu.CompilerParams(
            dimension_semantics=("parallel",)),
    )(q, w_eff, shift_eff)

    # Back to NCHW to match the PyTorch module's output layout.
    # TODO(synk): downstream consumers could take NHWC (M, out_ch) directly
    # and skip this transpose (one extra HBM round trip).
    return y.reshape(N, Ho, Wo, out_ch).transpose(0, 3, 1, 2)


def _reference_forward(x, conv_w, conv_b, gamma, beta, run_mean, run_var,
                       eps=1e-5):
    """Pure-JAX reference (unfolded math) for a tolerance check."""
    N, C, H, W = x.shape
    a = x[:, :, 0::2, 0::2]
    b = x[:, :, 0::2, 1::2]
    c = x[:, :, 1::2, 0::2]
    d = x[:, :, 1::2, 1::2]
    ll = (a + b + c + d) * 0.5
    s0 = (a + b - c - d) * 0.5
    s1 = (a - b + c - d) * 0.5
    s2 = (a - b - c + d) * 0.5
    feat = jnp.concatenate([ll, s0, s1, s2], axis=1)          # (N, 4C, Ho, Wo)
    w = conv_w[:, :, 0, 0]                                    # (out_ch, 4C)
    y = jnp.einsum('ok,nkhw->nohw', w, feat) + conv_b[None, :, None, None]
    scale = gamma / jnp.sqrt(run_var + eps)
    shift = beta - run_mean * scale
    y = y * scale[None, :, None, None] + shift[None, :, None, None]
    return jnp.maximum(y, 0.0)


if __name__ == "__main__":
    # Small deterministic example: batch=2, in_ch=4, spatial=16x16, out_ch=8.
    in_ch, out_ch = 4, 8
    N, H, W = 2, 16, 16

    key = jax.random.PRNGKey(0)
    kx, kw, kb, kg, kbeta, kmean, kvar = jax.random.split(key, 7)

    x = jax.random.normal(kx, (N, in_ch, H, W), dtype=jnp.float32)

    # Conv2d(in_ch*4, out_ch, kernel_size=1) parameters (PyTorch layout).
    conv_w = 0.1 * jax.random.normal(kw, (out_ch, 4 * in_ch, 1, 1),
                                     dtype=jnp.float32)
    conv_b = 0.1 * jax.random.normal(kb, (out_ch,), dtype=jnp.float32)

    # BatchNorm2d(out_ch) parameters (inference-mode running stats).
    gamma = 1.0 + 0.1 * jax.random.normal(kg, (out_ch,), dtype=jnp.float32)
    beta = 0.1 * jax.random.normal(kbeta, (out_ch,), dtype=jnp.float32)
    run_mean = 0.1 * jax.random.normal(kmean, (out_ch,), dtype=jnp.float32)
    run_var = jax.random.uniform(kvar, (out_ch,), dtype=jnp.float32,
                                 minval=0.5, maxval=1.5)

    out = down_wt_forward(x, conv_w, conv_b, gamma, beta, run_mean, run_var)
    out = jax.block_until_ready(out)

    assert out.shape == (N, out_ch, H // 2, W // 2), out.shape
    assert out.dtype == jnp.float32
    assert bool(jnp.all(out >= 0.0))  # ReLU sanity

    ref = _reference_forward(x, conv_w, conv_b, gamma, beta, run_mean, run_var)
    ref = jax.block_until_ready(ref)
    assert bool(jnp.allclose(out, ref, rtol=1e-4, atol=1e-4)), (
        float(jnp.max(jnp.abs(out - ref))))

    print("KERNEL_OK")
</pallas_src>

<mosaic_0001>
module attributes {stable_mosaic.version = 11 : i64} {
  func.func @_down_wt_kernel(%arg0: i32, %arg1: memref<64x16xf32, #tpu.memory_space<vmem>>, %arg2: memref<16x8xf32, #tpu.memory_space<vmem>>, %arg3: memref<1x8xf32, #tpu.memory_space<vmem>>, %arg4: memref<64x8xf32, #tpu.memory_space<vmem>>) attributes {dimension_semantics = [#tpu.dimension_semantics<parallel>], iteration_bounds = array<i64: 2>, scalar_prefetch = 0 : i64, scratch_operands = 0 : i64, tpu.core_type = #tpu.core_type<tc>, window_params = [{transform_indices = @transform_0, window_bounds = array<i64: 64, 16>}, {pipeline_mode = #tpu.pipeline_mode<synchronous>, transform_indices = @transform_1, window_bounds = array<i64: 16, 8>}, {pipeline_mode = #tpu.pipeline_mode<synchronous>, transform_indices = @transform_2, window_bounds = array<i64: 1, 8>}, {transform_indices = @transform_3, window_bounds = array<i64: 64, 8>}]} {
    %c0 = arith.constant 0 : index
    %c0_0 = arith.constant 0 : index
    %0 = vector.load %arg1[%c0, %c0_0] : memref<64x16xf32, #tpu.memory_space<vmem>>, vector<64x16xf32>
    %c0_1 = arith.constant 0 : index
    %c0_2 = arith.constant 0 : index
    %1 = vector.load %arg2[%c0_1, %c0_2] : memref<16x8xf32, #tpu.memory_space<vmem>>, vector<16x8xf32>
    %cst = arith.constant dense<0.000000e+00> : vector<64x8xf32>
    %2 = tpu.matmul %0, %1, %cst {dimension_numbers = #tpu.dot_dimension_numbers<[1], [0], [0], [1], [0, 0, 1, 1], [], []>} : vector<64x16xf32>, vector<16x8xf32>, vector<64x8xf32> -> vector<64x8xf32>
    %c0_3 = arith.constant 0 : index
    %c0_4 = arith.constant 0 : index
    %3 = vector.load %arg3[%c0_3, %c0_4] : memref<1x8xf32, #tpu.memory_space<vmem>>, vector<1x8xf32>
    %4 = vector.broadcast %3 : vector<1x8xf32> to vector<64x8xf32>
    %5 = arith.addf %2, %4 : vector<64x8xf32>
    %cst_5 = arith.constant 0.000000e+00 : f32
    %6 = vector.broadcast %cst_5 : f32 to vector<64x8xf32>
    %7 = arith.maximumf %5, %6 : vector<64x8xf32>
    %c0_6 = arith.constant 0 : index
    %c0_7 = arith.constant 0 : index
    %8 = vector.load %arg4[%c0_6, %c0_7] : memref<64x8xf32, #tpu.memory_space<vmem>>, vector<64x8xf32>
    tpu.vector_store %arg4[%c0_6, %c0_7], %7 {strides = array<i32>} : memref<64x8xf32, #tpu.memory_space<vmem>>, vector<64x8xf32>,
    return
  }
  func.func @transform_0(%arg0: i32) -> (i32, i32) {
    %c0_i32 = arith.constant 0 : i32
    %c0_i32_0 = arith.constant 0 : i32
    return %arg0, %c0_i32 : i32, i32
  }
  func.func @transform_1(%arg0: i32) -> (i32, i32) {
    %c0_i32 = arith.constant 0 : i32
    %c0_i32_0 = arith.constant 0 : i32
    %c0_i32_1 = arith.constant 0 : i32
    return %c0_i32, %c0_i32_0 : i32, i32
  }
  func.func @transform_2(%arg0: i32) -> (i32, i32) {
    %c0_i32 = arith.constant 0 : i32
    %c0_i32_0 = arith.constant 0 : i32
    %c0_i32_1 = arith.constant 0 : i32
    return %c0_i32, %c0_i32_0 : i32, i32
  }
  func.func @transform_3(%arg0: i32) -> (i32, i32) {
    %c0_i32 = arith.constant 0 : i32
    %c0_i32_0 = arith.constant 0 : i32
    return %arg0, %c0_i32 : i32, i32
  }
}

</mosaic_0001>

<bundles_post_ra>
// kernel: down_wt_forward.1
= control target key start
LH: loop header
LB: loop body
LE: loop exit
PB: predicated region body
PF: predicated region fallthrough
CT: control target
= control target key end

     0   :  { %s480_s12 = smov 0   ;;  %s522_s0 = inlined_call_operand.vmem [shape: f32[128,16], index: 0, kind: input, shape index: {}]   ;;  %s523_s1 = inlined_call_operand.vmem [shape: f32[16,8], index: 1, kind: input, shape index: {}]   ;;  %s524_s2 = inlined_call_operand.vmem [shape: f32[1,8], index: 2, kind: input, shape index: {}]   ;;  %s525_s3 = inlined_call_operand.vmem [shape: f32[128,8], index: 3, kind: output, shape index: {}]  }
   0x1 LB: > { %s394_s13 = sadd.s32 4294967295, %s458_s12   ;;  %p398_p0 = scmp.ge.s32.totalorder %s458_s12, 1  ;;  %s458_s12 = sphi %s480_s12, %s13_s12  }
   0x2   : > { %p138_p1 = scmp.lt.s32.totalorder %s458_s12, 3 }
   0x4   : > { %p139_p2 = pnand %p398_p0, %p138_p1 }
   0x5   : > { %s399_s18 = sshll.u32 (!%p139_p2), %s394_s13, 3 }
   0x6   : > { %142 = sbr.rel (%p139_p2) target bundleno = 221 (0xdd), region = 32  ;;  %p163_p3 = scmp.lt.s32.totalorder (!%p139_p2), %s399_s18, 15 }
   0xb   : > { %v183_v0 = vld [vmem:[%s523_s1 + $0x8] sm:$0xff]  ;;  %v182_v1 = vld [vmem:[%s523_s1] sm:$0xff]  ;;  %s527_s18 = smov (!%p163_p3, %s399_s18), 15  ;;  %vm191_vm0 = vcmask 130048   ;;  %vm329_vm1 = vcmask 64512  }
   0xc   : > { %424 = vmatprep.subr.mxu0 %v183_v0  ;;  %440 = vmatprep.subr.mxu1 %v183_v0  ;;  %s400_s19 = sshll.u32 %s527_s18, 3  ;;  %v403_v10 = vld [vmem:[%s524_s2] ss:$0 sm:$0xff] }
   0xd   : > { %425 = vmatpush3.msra.mxu0 %v183_v0  ;;  %442 = vmatpush3.msra.mxu1 %v183_v0  ;;  %s166_s22 = scalar_lea.vmem %s522_s0, %s400_s19  ;;  %s172_s27 = scalar_lea.vmem %s525_s3, %s400_s19 }
   0xe   : > { %426 = vmatprep.subr.mxu0 %v182_v1  ;;  %441 = vmatprep.subr.mxu1 %v182_v1  ;;  %v174_v2 = vld [vmem:[%s166_s22] sm:$0xff]  ;;  %v175_v4 = vld [vmem:[%s166_s22 + $0x8] sm:$0xff]  ;;  %v176_v6 = vld [vmem:[%s166_s22 + $0x10] sm:$0xff] }
   0xf   : > { %427 = vmatpush3.msra.mxu0 %v182_v1  ;;  %443 = vmatpush3.msra.mxu1 %v182_v1  ;;  %v178_v3 = vld [vmem:[%s166_s22 + $0x20] sm:$0xff]  ;;  %v179_v5 = vld [vmem:[%s166_s22 + $0x28] sm:$0xff]  ;;  %v180_v7 = vld [vmem:[%s166_s22 + $0x30] sm:$0xff] }
  0x10   : > { %428 = vmatprep.mubr.msk.f32.mxu0 %vm191_vm0, %v174_v2  ;;  %434 = vmatprep.mubr.msk.f32.mxu1 %vm191_vm0, %v178_v3  ;;  %v177_v8 = vld [vmem:[%s166_s22 + $0x18] sm:$0xff] }
  0x11   : > { %429 = vmatmul.mubr.msk.f32.vlgmr.msra.gmra.mxu0 %vm191_vm0, %v175_v4  ;;  %435 = vmatmul.mubr.msk.f32.vlgmr.msra.gmra.mxu1 %vm191_vm0, %v179_v5  ;;  %v181_v9 = vld [vmem:[%s166_s22 + $0x38] sm:$0xff] }
  0x12   : > { %431 = vmatprep.mubr.msk.f32.mxu0 %vm191_vm0, %v176_v6  ;;  %437 = vmatprep.mubr.msk.f32.mxu1 %vm191_vm0, %v180_v7 }
  0x15   : > { %432 = vmatmul.mubr.msk.f32.gmra.mxu0 %vm191_vm0, %v177_v8  ;;  %438 = vmatmul.mubr.msk.f32.gmra.mxu1 %vm191_vm0, %v181_v9 }
  0xd1   : > { %v430_v11 = vpop.f32.mrf.mxu0  ;;  %v436_v12 = vpop.f32.mrf.mxu1 }
  0xd2   : > { %v288_v13 = vadd.f32 %v430_v11, %v403_v10  ;;  %v308_v14 = vadd.f32 %v436_v12, %v403_v10 }
  0xd3   : > { %v282_v15 = vpop.f32.mrf.mxu0  ;;  %v302_v16 = vpop.f32.mrf.mxu1 }
  0xd4   : > { %v322_v17 = vmax.f32 %v288_v13, 0.0  ;;  %v326_v18 = vmax.f32 %v308_v14, 0.0  ;;  %v283_v19 = vadd.f32 %v403_v10, %v282_v15  ;;  %v303_v20 = vadd.f32 %v403_v10, %v302_v16 }
  0xd5   : > { %v433_v21 = vpop.f32.mrf.mxu0  ;;  %v439_v22 = vpop.f32.mrf.mxu1 }
  0xd6   : > { %331 = vst.msk [vmem:[%s172_s27 + $0x8] sm:$0xff] %vm329_vm1, %v322_v17  ;;  %335 = vst.msk [vmem:[%s172_s27 + $0x28] sm:$0xff] %vm329_vm1, %v326_v18  ;;  %v321_v23 = vmax.f32 %v283_v19, 0.0  ;;  %v325_v24 = vmax.f32 %v303_v20, 0.0  ;;  %v298_v25 = vadd.f32 %v433_v21, %v403_v10  ;;  %v318_v26 = vadd.f32 %v439_v22, %v403_v10 }
  0xd7   : > { %v292_v27 = vpop.f32.mrf.mxu0  ;;  %v312_v28 = vpop.f32.mrf.mxu1 }
  0xd8   : > { %330 = vst.msk [vmem:[%s172_s27] sm:$0xff] %vm329_vm1, %v321_v23  ;;  %334 = vst.msk [vmem:[%s172_s27 + $0x20] sm:$0xff] %vm329_vm1, %v325_v24  ;;  %v324_v29 = vmax.f32 %v298_v25, 0.0  ;;  %v328_v30 = vmax.f32 %v318_v26, 0.0  ;;  %v293_v31 = vadd.f32 %v403_v10, %v292_v27  ;;  %v313_v32 = vadd.f32 %v403_v10, %v312_v28 }
  0xda   : > { %333 = vst.msk [vmem:[%s172_s27 + $0x18] sm:$0xff] %vm329_vm1, %v324_v29  ;;  %337 = vst.msk [vmem:[%s172_s27 + $0x38] sm:$0xff] %vm329_vm1, %v328_v30  ;;  %v323_v33 = vmax.f32 %v293_v31, 0.0  ;;  %v327_v34 = vmax.f32 %v313_v32, 0.0 }
  0xdc   : > { %332 = vst.msk [vmem:[%s172_s27 + $0x10] sm:$0xff] %vm329_vm1, %v323_v33  ;;  %336 = vst.msk [vmem:[%s172_s27 + $0x30] sm:$0xff] %vm329_vm1, %v327_v34 }
  0xdd PF: > { %s13_s12 = sadd.s32 1, %s458_s12  }
  0xde   : > { %p10_p4 = scmp.ge.s32.totalorder %s13_s12, 4  }
  0xe0   :  { %12 = sbr.rel (!%p10_p4) target bundleno = 1 (0x1), region = 62 }

</bundles_post_ra>
